<compile_context>
chip_gen: v7x
topology: tpu7x:2x2x1
jax: 0.10.0
libtpu: 0.0.40
codegen_flags: <defaults>
</compile_context>

<pallas_src>
import functools

import jax
import jax.numpy as jnp
import numpy as np
from jax import lax
from jax.experimental import pallas as pl
from jax.experimental.pallas import tpu as pltpu


def _conv3x3_kernel(x_ref, halo_ref, w_ref, b_ref, o_ref, *, W, L, merge_k):
    """One (batch, row-tile) grid step of the 3x3 conv (pre pixel-shuffle).

    x_ref   : (1, Cin, L)        flattened row tile (L = rows_per_tile * W), lanes = spatial
    halo_ref: (1, 1, 2, Cin, W)  image rows just above / below the tile (zeros at borders)
    w_ref   : (Cout, 9*Cin)      merged-K weights, rows ordered (kx, ky, cin)   [merge_k]
              (9, Cout, Cin)     per-tap weights, tap = 3*ky + kx               [fallback]
    b_ref   : (Cout, 1)          bias (f32)
    o_ref   : (1, Cout, L)       conv output tile (pre pixel-shuffle), lane-dense store
    """
    x = x_ref[0]              # (Cin, L)
    top = halo_ref[0, 0, 0]   # (Cin, W)
    bot = halo_ref[0, 0, 1]   # (Cin, W)

    # Row-shifted copies of the tile: x_up[f] = X[f - W], x_dn[f] = X[f + W],
    # with the halo rows spliced in at the tile boundary (lane-axis concat).
    if L == W:                # single-row tile: shifted tiles are exactly the halos
        x_up, x_dn = top, bot
    else:
        x_up = jnp.concatenate([top, x[:, :L - W]], axis=1)
        x_dn = jnp.concatenate([x[:, W:], bot], axis=1)

    # Column index of every lane + edge masks, computed ONCE and reused by all taps.
    col = lax.broadcasted_iota(jnp.int32, (1, L), 1) % W
    mask_l = col != 0         # a left neighbour exists  (kx = 0 taps)
    mask_r = col != W - 1     # a right neighbour exists (kx = 2 taps)

    if merge_k:
        # Stack all 9 taps along the matmul K axis -> one MXU call.
        xs = jnp.concatenate([x_up, x, x_dn], axis=0)                  # (3Cin, L), rows (ky, cin)
        left = jnp.where(mask_l, jnp.roll(xs, 1, axis=1), 0.0)         # kx = 0  (static lane roll)
        right = jnp.where(mask_r, jnp.roll(xs, -1, axis=1), 0.0)       # kx = 2
        operand = jnp.concatenate([left, xs, right], axis=0)           # (9Cin, L), rows (kx, ky, cin)
        acc = jnp.dot(w_ref[...], operand, preferred_element_type=jnp.float32)
    else:
        # Proven per-tap path (kept for sublane-unaligned Cin), masks hoisted.
        Cout = w_ref.shape[1]
        acc = jnp.zeros((Cout, L), jnp.float32)
        tap = 0
        for base in (x_up, x, x_dn):                                   # ky = 0, 1, 2
            left = jnp.where(mask_l, jnp.roll(base, 1, axis=1), 0.0)   # kx = 0
            right = jnp.where(mask_r, jnp.roll(base, -1, axis=1), 0.0) # kx = 2
            for shifted in (left, base, right):                        # kx = 0, 1, 2
                acc = acc + jnp.dot(w_ref[tap], shifted,
                                    preferred_element_type=jnp.float32)
                tap += 1

    o_ref[0] = (acc + b_ref[...]).astype(o_ref.dtype)


def _bytes_per_lane(Cin, Cout, itemsize):
    """Rough per-lane VMEM footprint of one grid step: double-buffered in/out
    blocks + two row-shifted copies + the 9-tap stacked operand + f32 acc."""
    return (2 * Cin + 2 * Cout + 2 * Cin + 9 * Cin) * itemsize + Cout * 4


def _choose_row_tile(H, W, *, max_lanes, target_lanes, lane_pref, min_tiles):
    """Pick rows-per-tile Ht (a divisor of H).  The flattened lane count Ht*W
    must be a multiple of 128 (or the whole image), should stay inside the VMEM
    lane budget, be as close as possible to target_lanes (preferring lane_pref
    multiples) and give at least `min_tiles` grid steps when possible."""
    candidates = []
    for d in range(1, H + 1):
        if H % d:
            continue
        lanes = d * W
        if d != H and lanes % 128 != 0:
            continue  # partial blocks must respect the 128-lane tiling
        score = (H // d < min_tiles,           # prefer >= min_tiles parallel steps (v7x 2 TCs)
                 lanes > max_lanes,            # prefer staying inside the VMEM budget
                 0 if lanes % lane_pref == 0 else 1,
                 abs(lanes - target_lanes))
        candidates.append((score, d))
    # TODO(synk): if no divisor gives a 128-lane multiple (awkward H/W) this falls
    # back to the whole image in one block; for large images pad W to a lane
    # multiple instead of risking a VMEM overflow (esp. v7x's 64 MiB per core).
    candidates.sort()
    return candidates[0][1]


def _tpu_vmem_and_kind():
    """(per-core VMEM bytes, device kind string) with conservative fallbacks."""
    try:
        cap = int(getattr(pltpu.get_tpu_info(), "vmem_capacity_bytes", 0)) or None
    except Exception:
        cap = None
    if cap is None:
        cap = 64 * 1024 * 1024            # conservative default (v7x per-core VMEM)
    try:
        kind = jax.devices()[0].device_kind.lower()
    except Exception:
        kind = ""
    return cap, kind


def upsample_one_step(x_nchw, w_oihw, bias, scale, num_out_ch, row_tile=None):
    """Forward pass of UpsampleOneStep (NCHW in / NCHW out), Pallas conv kernel."""
    N, Cin, H, W = x_nchw.shape
    Cout = w_oihw.shape[0]
    assert Cout == scale * scale * num_out_ch
    itemsize = jnp.dtype(x_nchw.dtype).itemsize

    # Generation-aware VMEM budget and lane-tile target.
    vmem_cap, kind = _tpu_vmem_and_kind()
    vmem_limit = int(min(max(vmem_cap * 3 // 4, 32 * 1024 * 1024), 96 * 1024 * 1024))
    lane_budget = int(vmem_limit * 0.85)
    bpl = _bytes_per_lane(Cin, Cout, itemsize)
    max_lanes = max(lane_budget // bpl, 128)
    target_lanes = min(max_lanes, 16 * 1024)          # ~4K-16K lanes per grid step
    lane_pref = 128 if ("v5e" in kind or "v5 lite" in kind) else 256

    if row_tile is None:
        Ht = _choose_row_tile(H, W, max_lanes=max_lanes, target_lanes=target_lanes,
                              lane_pref=lane_pref, min_tiles=2 if N == 1 else 1)
    else:
        Ht = row_tile
        if H % Ht != 0 or (Ht != H and (Ht * W) % 128 != 0):
            raise ValueError(f"invalid row_tile={Ht} for H={H}, W={W}")
    nt = H // Ht
    L = Ht * W

    # Free, contiguous reshape: spatial flattened onto the lane axis (NCHW order kept).
    x_flat = x_nchw.reshape(N, Cin, H * W)

    # Halo rows per tile (zeros at the image border), packed as one side input
    # (N, nt, 2, Cin, W) so each grid step issues a single halo DMA.
    zrow = jnp.zeros((N, Cin, 1, W), x_nchw.dtype)
    if nt > 1:
        top = jnp.concatenate([zrow, x_nchw[:, :, Ht - 1:H - 1:Ht, :]], axis=2)
        bot = jnp.concatenate([x_nchw[:, :, Ht::Ht, :], zrow], axis=2)
    else:
        top, bot = zrow, zrow
    halos = jnp.transpose(jnp.stack([top, bot], axis=2), (0, 3, 2, 1, 4))

    # Weights: merged-K slab when Cin is sublane-aligned (8), per-tap otherwise.
    merge_k = (Cin % 8 == 0)
    if merge_k:
        # stacked operand rows are ordered (kx, ky, cin)  ->  OIHW -> (O, Kx, Ky, I)
        w_arg = jnp.transpose(w_oihw, (0, 3, 2, 1)).reshape(Cout, 9 * Cin)
        w_spec = pl.BlockSpec((Cout, 9 * Cin), lambda n, i: (0, 0))
    else:
        # per-tap (tap = 3*ky + kx)  ->  OIHW -> (HW, O, I)
        w_arg = jnp.transpose(w_oihw, (2, 3, 0, 1)).reshape(9, Cout, Cin)
        w_spec = pl.BlockSpec((9, Cout, Cin), lambda n, i: (0, 0, 0))
    b2 = bias.reshape(Cout, 1).astype(jnp.float32)

    kernel = functools.partial(_conv3x3_kernel, W=W, L=L, merge_k=merge_k)

    flops = 2 * N * H * W * 9 * Cin * Cout
    bytes_accessed = int((x_flat.size + N * Cout * H * W) * itemsize
                         + w_arg.size * w_arg.dtype.itemsize
                         + halos.size * itemsize + b2.size * 4)

    y_flat = pl.pallas_call(
        kernel,
        out_shape=jax.ShapeDtypeStruct((N, Cout, H * W), x_nchw.dtype),
        grid_spec=pltpu.PrefetchScalarGridSpec(
            num_scalar_prefetch=0,
            grid=(N, nt),
            in_specs=[
                pl.BlockSpec((1, Cin, L), lambda n, i: (n, 0, i)),
                pl.BlockSpec((1, 1, 2, Cin, W), lambda n, i: (n, i, 0, 0, 0)),
                w_spec,
                pl.BlockSpec((Cout, 1), lambda n, i: (0, 0)),
            ],
            out_specs=pl.BlockSpec((1, Cout, L), lambda n, i: (n, 0, i)),
        ),
        compiler_params=pltpu.CompilerParams(
            dimension_semantics=("parallel", "parallel"),
            vmem_limit_bytes=vmem_limit),
        cost_estimate=pl.CostEstimate(flops=flops, transcendentals=0,
                                      bytes_accessed=bytes_accessed),
    )(x_flat, halos, w_arg, b2)

    # PixelShuffle: out[n, c, h*s+s1, w*s+s2] = conv[n, c*s^2 + s1*s + s2, h, w].
    # TODO(synk): fusing this interleave into the kernel store would save one full
    # HBM read+write of the conv output (~25-30% of traffic at Cin=64), but the
    # (w, s2) lane interleave needs a lane gather / strided lane store whose Mosaic
    # lowering is not guaranteed; kept as a single XLA transpose pass for safety.
    y = y_flat.reshape(N, num_out_ch, scale, scale, H, W)
    y = jnp.transpose(y, (0, 1, 4, 2, 5, 3))
    return y.reshape(N, num_out_ch, H * scale, W * scale)


def _reference(x_nchw, w_oihw, bias, scale, num_out_ch):
    """Plain-JAX reference (conv + pixel shuffle) for correctness checking."""
    y = lax.conv_general_dilated(
        x_nchw, w_oihw, window_strides=(1, 1), padding=((1, 1), (1, 1)),
        dimension_numbers=("NCHW", "OIHW", "NCHW"))
    y = y + bias[None, :, None, None]
    N, C, H, W = y.shape
    y = y.reshape(N, num_out_ch, scale, scale, H, W)
    y = jnp.transpose(y, (0, 1, 4, 2, 5, 3))
    return y.reshape(N, num_out_ch, H * scale, W * scale)


def _make_params(key, Cin, Cout):
    """Deterministic synthetic Conv2d(Cin, Cout, 3, 1, 1) parameters."""
    kw, kb = jax.random.split(key)
    fan_in = Cin * 9
    bound = 1.0 / np.sqrt(fan_in)
    w = jax.random.uniform(kw, (Cout, Cin, 3, 3), jnp.float32, -bound, bound)
    b = jax.random.uniform(kb, (Cout,), jnp.float32, -bound, bound)
    return w, b


if __name__ == "__main__":
    key = jax.random.PRNGKey(0)
    configs = [
        # (scale, num_feat, num_out_ch, N, H, W, row_tile)
        (2, 4, 3, 2, 16, 16, None),   # small module config, auto tile (whole image per step)
        (2, 4, 3, 2, 16, 16, 8),      # explicit 8-row tiles: halo / multi-tile path
        (3, 8, 2, 1, 16, 16, None),   # merged-K path (Cin%8==0), forced nt>=2 for N==1, scale 3
    ]
    for cfg_i, (scale, num_feat, num_out_ch, N, H, W, rt) in enumerate(configs):
        kx, kp, key = jax.random.split(key, 3)
        Cout = scale * scale * num_out_ch
        x = jax.random.normal(kx, (N, num_feat, H, W), dtype=jnp.float32)
        w, b = _make_params(kp, num_feat, Cout)

        out = jax.block_until_ready(
            upsample_one_step(x, w, b, scale, num_out_ch, row_tile=rt))
        ref = jax.block_until_ready(_reference(x, w, b, scale, num_out_ch))

        assert out.shape == (N, num_out_ch, H * scale, W * scale), (cfg_i, out.shape)
        np.testing.assert_allclose(np.asarray(out), np.asarray(ref),
                                   rtol=1e-5, atol=1e-5)

    print("KERNEL_OK")
</pallas_src>

<mosaic_0001>
module attributes {stable_mosaic.version = 11 : i64} {
  func.func @_conv3x3_kernel(%arg0: i32, %arg1: i32, %arg2: memref<1x4x256xf32, #tpu.memory_space<vmem>>, %arg3: memref<1x1x2x4x16xf32, #tpu.memory_space<vmem>>, %arg4: memref<9x12x4xf32, #tpu.memory_space<vmem>>, %arg5: memref<12x1xf32, #tpu.memory_space<vmem>>, %arg6: memref<1x12x256xf32, #tpu.memory_space<vmem>>) attributes {dimension_semantics = [#tpu.dimension_semantics<parallel>, #tpu.dimension_semantics<parallel>], iteration_bounds = array<i64: 2, 1>, scalar_prefetch = 0 : i64, scratch_operands = 0 : i64, tpu.core_type = #tpu.core_type<tc>, window_params = [{transform_indices = @transform_0, window_bounds = array<i64: 1, 4, 256>}, {transform_indices = @transform_1, window_bounds = array<i64: 1, 1, 2, 4, 16>}, {pipeline_mode = #tpu.pipeline_mode<synchronous>, transform_indices = @transform_2, window_bounds = array<i64: 9, 12, 4>}, {pipeline_mode = #tpu.pipeline_mode<synchronous>, transform_indices = @transform_3, window_bounds = array<i64: 12, 1>}, {transform_indices = @transform_4, window_bounds = array<i64: 1, 12, 256>}]} {
    %c0 = arith.constant 0 : index
    %c0_0 = arith.constant 0 : index
    %c0_1 = arith.constant 0 : index
    %0 = vector.load %arg2[%c0, %c0_0, %c0_1] : memref<1x4x256xf32, #tpu.memory_space<vmem>>, vector<1x4x256xf32>
    %1 = vector.shape_cast %0 : vector<1x4x256xf32> to vector<4x256xf32>
    %c0_2 = arith.constant 0 : index
    %c0_3 = arith.constant 0 : index
    %c0_4 = arith.constant 0 : index
    %c0_5 = arith.constant 0 : index
    %c0_6 = arith.constant 0 : index
    %2 = vector.load %arg3[%c0_2, %c0_3, %c0_4, %c0_5, %c0_6] : memref<1x1x2x4x16xf32, #tpu.memory_space<vmem>>, vector<1x1x1x4x16xf32>
    %3 = vector.shape_cast %2 : vector<1x1x1x4x16xf32> to vector<4x16xf32>
    %c0_7 = arith.constant 0 : index
    %c0_8 = arith.constant 0 : index
    %c1 = arith.constant 1 : index
    %c0_9 = arith.constant 0 : index
    %c0_10 = arith.constant 0 : index
    %4 = vector.load %arg3[%c0_7, %c0_8, %c1, %c0_9, %c0_10] : memref<1x1x2x4x16xf32, #tpu.memory_space<vmem>>, vector<1x1x1x4x16xf32>
    %5 = vector.shape_cast %4 : vector<1x1x1x4x16xf32> to vector<4x16xf32>
    %6 = vector.extract_strided_slice %1 {offsets = [0, 0], sizes = [4, 240], strides = [1, 1]} : vector<4x256xf32> to vector<4x240xf32>
    %7 = tpu.concatenate %3, %6 in 1 : vector<4x16xf32>, vector<4x240xf32> -> vector<4x256xf32>
    %8 = vector.extract_strided_slice %1 {offsets = [0, 16], sizes = [4, 240], strides = [1, 1]} : vector<4x256xf32> to vector<4x240xf32>
    %9 = tpu.concatenate %8, %5 in 1 : vector<4x240xf32>, vector<4x16xf32> -> vector<4x256xf32>
    %10 = tpu.iota {dimensions = array<i32: 1>} : vector<1x256xi32>
    %c16_i32 = arith.constant 16 : i32
    %c0_i32 = arith.constant 0 : i32
    %11 = arith.cmpi eq, %c16_i32, %c0_i32 : i32
    %c1_i32 = arith.constant 1 : i32
    %12 = arith.select %11, %c1_i32, %c16_i32 : i32
    %13 = vector.broadcast %12 : i32 to vector<1x256xi32>
    %14 = arith.remsi %10, %13 : vector<1x256xi32>
    %c0_i32_11 = arith.constant 0 : i32
    %15 = vector.broadcast %c0_i32_11 : i32 to vector<1x256xi32>
    %16 = arith.cmpi ne, %14, %15 : vector<1x256xi32>
    %c0_i32_12 = arith.constant 0 : i32
    %17 = vector.broadcast %c0_i32_12 : i32 to vector<1x256xi32>
    %18 = arith.cmpi slt, %14, %17 : vector<1x256xi32>
    %c0_i32_13 = arith.constant 0 : i32
    %19 = arith.cmpi slt, %12, %c0_i32_13 : i32
    %20 = vector.broadcast %19 : i1 to vector<1x256xi1>
    %21 = vector.broadcast %20 : vector<1x256xi1> to vector<1x256xi1>
    %22 = arith.xori %18, %21 : vector<1x256xi1>
    %23 = arith.andi %22, %16 : vector<1x256xi1>
    %24 = vector.broadcast %12 : i32 to vector<1x256xi32>
    %25 = arith.addi %14, %24 : vector<1x256xi32>
    %26 = arith.select %23, %25, %14 : vector<1x256xi1>, vector<1x256xi32>
    %c0_i32_14 = arith.constant 0 : i32
    %27 = vector.broadcast %c0_i32_14 : i32 to vector<1x256xi32>
    %28 = arith.cmpi ne, %26, %27 : vector<1x256xi32>
    %c15_i32 = arith.constant 15 : i32
    %29 = vector.broadcast %c15_i32 : i32 to vector<1x256xi32>
    %30 = arith.cmpi ne, %26, %29 : vector<1x256xi32>
    %cst = arith.constant 0.000000e+00 : f32
    %31 = vector.broadcast %cst : f32 to vector<12x256xf32>
    %32 = vector.extract_strided_slice %7 {offsets = [0, 255], sizes = [4, 1], strides = [1, 1]} : vector<4x256xf32> to vector<4x1xf32>
    %33 = vector.extract_strided_slice %7 {offsets = [0, 0], sizes = [4, 255], strides = [1, 1]} : vector<4x256xf32> to vector<4x255xf32>
    %34 = tpu.concatenate %32, %33 in 1 : vector<4x1xf32>, vector<4x255xf32> -> vector<4x256xf32>
    %cst_15 = arith.constant 0.000000e+00 : f32
    %35 = vector.shape_cast %28 : vector<1x256xi1> to vector<1x256xi1>
    %36 = vector.broadcast %35 : vector<1x256xi1> to vector<4x256xi1>
    %37 = vector.broadcast %cst_15 : f32 to vector<4x256xf32>
    %38 = arith.select %36, %34, %37 : vector<4x256xi1>, vector<4x256xf32>
    %39 = vector.extract_strided_slice %7 {offsets = [0, 1], sizes = [4, 255], strides = [1, 1]} : vector<4x256xf32> to vector<4x255xf32>
    %40 = vector.extract_strided_slice %7 {offsets = [0, 0], sizes = [4, 1], strides = [1, 1]} : vector<4x256xf32> to vector<4x1xf32>
    %41 = tpu.concatenate %39, %40 in 1 : vector<4x255xf32>, vector<4x1xf32> -> vector<4x256xf32>
    %cst_16 = arith.constant 0.000000e+00 : f32
    %42 = vector.shape_cast %30 : vector<1x256xi1> to vector<1x256xi1>
    %43 = vector.broadcast %42 : vector<1x256xi1> to vector<4x256xi1>
    %44 = vector.broadcast %cst_16 : f32 to vector<4x256xf32>
    %45 = arith.select %43, %41, %44 : vector<4x256xi1>, vector<4x256xf32>
    %c0_17 = arith.constant 0 : index
    %c0_18 = arith.constant 0 : index
    %c0_19 = arith.constant 0 : index
    %46 = vector.load %arg4[%c0_17, %c0_18, %c0_19] : memref<9x12x4xf32, #tpu.memory_space<vmem>>, vector<1x12x4xf32>
    %47 = vector.shape_cast %46 : vector<1x12x4xf32> to vector<12x4xf32>
    %cst_20 = arith.constant dense<0.000000e+00> : vector<12x256xf32>
    %48 = tpu.matmul %47, %38, %cst_20 {dimension_numbers = #tpu.dot_dimension_numbers<[1], [0], [0], [1], [0, 0, 1, 1], [], []>} : vector<12x4xf32>, vector<4x256xf32>, vector<12x256xf32> -> vector<12x256xf32>
    %49 = arith.addf %31, %48 : vector<12x256xf32>
    %c1_21 = arith.constant 1 : index
    %c0_22 = arith.constant 0 : index
    %c0_23 = arith.constant 0 : index
    %50 = vector.load %arg4[%c1_21, %c0_22, %c0_23] : memref<9x12x4xf32, #tpu.memory_space<vmem>>, vector<1x12x4xf32>
    %51 = vector.shape_cast %50 : vector<1x12x4xf32> to vector<12x4xf32>
    %cst_24 = arith.constant dense<0.000000e+00> : vector<12x256xf32>
    %52 = tpu.matmul %51, %7, %cst_24 {dimension_numbers = #tpu.dot_dimension_numbers<[1], [0], [0], [1], [0, 0, 1, 1], [], []>} : vector<12x4xf32>, vector<4x256xf32>, vector<12x256xf32> -> vector<12x256xf32>
    %53 = arith.addf %49, %52 : vector<12x256xf32>
    %c2 = arith.constant 2 : index
    %c0_25 = arith.constant 0 : index
    %c0_26 = arith.constant 0 : index
    %54 = vector.load %arg4[%c2, %c0_25, %c0_26] : memref<9x12x4xf32, #tpu.memory_space<vmem>>, vector<1x12x4xf32>
    %55 = vector.shape_cast %54 : vector<1x12x4xf32> to vector<12x4xf32>
    %cst_27 = arith.constant dense<0.000000e+00> : vector<12x256xf32>
    %56 = tpu.matmul %55, %45, %cst_27 {dimension_numbers = #tpu.dot_dimension_numbers<[1], [0], [0], [1], [0, 0, 1, 1], [], []>} : vector<12x4xf32>, vector<4x256xf32>, vector<12x256xf32> -> vector<12x256xf32>
    %57 = arith.addf %53, %56 : vector<12x256xf32>
    %58 = vector.extract_strided_slice %1 {offsets = [0, 255], sizes = [4, 1], strides = [1, 1]} : vector<4x256xf32> to vector<4x1xf32>
    %59 = vector.extract_strided_slice %1 {offsets = [0, 0], sizes = [4, 255], strides = [1, 1]} : vector<4x256xf32> to vector<4x255xf32>
    %60 = tpu.concatenate %58, %59 in 1 : vector<4x1xf32>, vector<4x255xf32> -> vector<4x256xf32>
    %cst_28 = arith.constant 0.000000e+00 : f32
    %61 = vector.shape_cast %28 : vector<1x256xi1> to vector<1x256xi1>
    %62 = vector.broadcast %61 : vector<1x256xi1> to vector<4x256xi1>
    %63 = vector.broadcast %cst_28 : f32 to vector<4x256xf32>
    %64 = arith.select %62, %60, %63 : vector<4x256xi1>, vector<4x256xf32>
    %65 = vector.extract_strided_slice %1 {offsets = [0, 1], sizes = [4, 255], strides = [1, 1]} : vector<4x256xf32> to vector<4x255xf32>
    %66 = vector.extract_strided_slice %1 {offsets = [0, 0], sizes = [4, 1], strides = [1, 1]} : vector<4x256xf32> to vector<4x1xf32>
    %67 = tpu.concatenate %65, %66 in 1 : vector<4x255xf32>, vector<4x1xf32> -> vector<4x256xf32>
    %cst_29 = arith.constant 0.000000e+00 : f32
    %68 = vector.shape_cast %30 : vector<1x256xi1> to vector<1x256xi1>
    %69 = vector.broadcast %68 : vector<1x256xi1> to vector<4x256xi1>
    %70 = vector.broadcast %cst_29 : f32 to vector<4x256xf32>
    %71 = arith.select %69, %67, %70 : vector<4x256xi1>, vector<4x256xf32>
    %c3 = arith.constant 3 : index
    %c0_30 = arith.constant 0 : index
    %c0_31 = arith.constant 0 : index
    %72 = vector.load %arg4[%c3, %c0_30, %c0_31] : memref<9x12x4xf32, #tpu.memory_space<vmem>>, vector<1x12x4xf32>
    %73 = vector.shape_cast %72 : vector<1x12x4xf32> to vector<12x4xf32>
    %cst_32 = arith.constant dense<0.000000e+00> : vector<12x256xf32>
    %74 = tpu.matmul %73, %64, %cst_32 {dimension_numbers = #tpu.dot_dimension_numbers<[1], [0], [0], [1], [0, 0, 1, 1], [], []>} : vector<12x4xf32>, vector<4x256xf32>, vector<12x256xf32> -> vector<12x256xf32>
    %75 = arith.addf %57, %74 : vector<12x256xf32>
    %c4 = arith.constant 4 : index
    %c0_33 = arith.constant 0 : index
    %c0_34 = arith.constant 0 : index
    %76 = vector.load %arg4[%c4, %c0_33, %c0_34] : memref<9x12x4xf32, #tpu.memory_space<vmem>>, vector<1x12x4xf32>
    %77 = vector.shape_cast %76 : vector<1x12x4xf32> to vector<12x4xf32>
    %cst_35 = arith.constant dense<0.000000e+00> : vector<12x256xf32>
    %78 = tpu.matmul %77, %1, %cst_35 {dimension_numbers = #tpu.dot_dimension_numbers<[1], [0], [0], [1], [0, 0, 1, 1], [], []>} : vector<12x4xf32>, vector<4x256xf32>, vector<12x256xf32> -> vector<12x256xf32>
    %79 = arith.addf %75, %78 : vector<12x256xf32>
    %c5 = arith.constant 5 : index
    %c0_36 = arith.constant 0 : index
    %c0_37 = arith.constant 0 : index
    %80 = vector.load %arg4[%c5, %c0_36, %c0_37] : memref<9x12x4xf32, #tpu.memory_space<vmem>>, vector<1x12x4xf32>
    %81 = vector.shape_cast %80 : vector<1x12x4xf32> to vector<12x4xf32>
    %cst_38 = arith.constant dense<0.000000e+00> : vector<12x256xf32>
    %82 = tpu.matmul %81, %71, %cst_38 {dimension_numbers = #tpu.dot_dimension_numbers<[1], [0], [0], [1], [0, 0, 1, 1], [], []>} : vector<12x4xf32>, vector<4x256xf32>, vector<12x256xf32> -> vector<12x256xf32>
    %83 = arith.addf %79, %82 : vector<12x256xf32>
    %84 = vector.extract_strided_slice %9 {offsets = [0, 255], sizes = [4, 1], strides = [1, 1]} : vector<4x256xf32> to vector<4x1xf32>
    %85 = vector.extract_strided_slice %9 {offsets = [0, 0], sizes = [4, 255], strides = [1, 1]} : vector<4x256xf32> to vector<4x255xf32>
    %86 = tpu.concatenate %84, %85 in 1 : vector<4x1xf32>, vector<4x255xf32> -> vector<4x256xf32>
    %cst_39 = arith.constant 0.000000e+00 : f32
    %87 = vector.shape_cast %28 : vector<1x256xi1> to vector<1x256xi1>
    %88 = vector.broadcast %87 : vector<1x256xi1> to vector<4x256xi1>
    %89 = vector.broadcast %cst_39 : f32 to vector<4x256xf32>
    %90 = arith.select %88, %86, %89 : vector<4x256xi1>, vector<4x256xf32>
    %91 = vector.extract_strided_slice %9 {offsets = [0, 1], sizes = [4, 255], strides = [1, 1]} : vector<4x256xf32> to vector<4x255xf32>
    %92 = vector.extract_strided_slice %9 {offsets = [0, 0], sizes = [4, 1], strides = [1, 1]} : vector<4x256xf32> to vector<4x1xf32>
    %93 = tpu.concatenate %91, %92 in 1 : vector<4x255xf32>, vector<4x1xf32> -> vector<4x256xf32>
    %cst_40 = arith.constant 0.000000e+00 : f32
    %94 = vector.shape_cast %30 : vector<1x256xi1> to vector<1x256xi1>
    %95 = vector.broadcast %94 : vector<1x256xi1> to vector<4x256xi1>
    %96 = vector.broadcast %cst_40 : f32 to vector<4x256xf32>
    %97 = arith.select %95, %93, %96 : vector<4x256xi1>, vector<4x256xf32>
    %c6 = arith.constant 6 : index
    %c0_41 = arith.constant 0 : index
    %c0_42 = arith.constant 0 : index
    %98 = vector.load %arg4[%c6, %c0_41, %c0_42] : memref<9x12x4xf32, #tpu.memory_space<vmem>>, vector<1x12x4xf32>
    %99 = vector.shape_cast %98 : vector<1x12x4xf32> to vector<12x4xf32>
    %cst_43 = arith.constant dense<0.000000e+00> : vector<12x256xf32>
    %100 = tpu.matmul %99, %90, %cst_43 {dimension_numbers = #tpu.dot_dimension_numbers<[1], [0], [0], [1], [0, 0, 1, 1], [], []>} : vector<12x4xf32>, vector<4x256xf32>, vector<12x256xf32> -> vector<12x256xf32>
    %101 = arith.addf %83, %100 : vector<12x256xf32>
    %c7 = arith.constant 7 : index
    %c0_44 = arith.constant 0 : index
    %c0_45 = arith.constant 0 : index
    %102 = vector.load %arg4[%c7, %c0_44, %c0_45] : memref<9x12x4xf32, #tpu.memory_space<vmem>>, vector<1x12x4xf32>
    %103 = vector.shape_cast %102 : vector<1x12x4xf32> to vector<12x4xf32>
    %cst_46 = arith.constant dense<0.000000e+00> : vector<12x256xf32>
    %104 = tpu.matmul %103, %9, %cst_46 {dimension_numbers = #tpu.dot_dimension_numbers<[1], [0], [0], [1], [0, 0, 1, 1], [], []>} : vector<12x4xf32>, vector<4x256xf32>, vector<12x256xf32> -> vector<12x256xf32>
    %105 = arith.addf %101, %104 : vector<12x256xf32>
    %c8 = arith.constant 8 : index
    %c0_47 = arith.constant 0 : index
    %c0_48 = arith.constant 0 : index
    %106 = vector.load %arg4[%c8, %c0_47, %c0_48] : memref<9x12x4xf32, #tpu.memory_space<vmem>>, vector<1x12x4xf32>
    %107 = vector.shape_cast %106 : vector<1x12x4xf32> to vector<12x4xf32>
    %cst_49 = arith.constant dense<0.000000e+00> : vector<12x256xf32>
    %108 = tpu.matmul %107, %97, %cst_49 {dimension_numbers = #tpu.dot_dimension_numbers<[1], [0], [0], [1], [0, 0, 1, 1], [], []>} : vector<12x4xf32>, vector<4x256xf32>, vector<12x256xf32> -> vector<12x256xf32>
    %109 = arith.addf %105, %108 : vector<12x256xf32>
    %c0_50 = arith.constant 0 : index
    %c0_51 = arith.constant 0 : index
    %110 = vector.load %arg5[%c0_50, %c0_51] : memref<12x1xf32, #tpu.memory_space<vmem>>, vector<12x1xf32>
    %111 = vector.broadcast %110 : vector<12x1xf32> to vector<12x256xf32>
    %112 = arith.addf %109, %111 : vector<12x256xf32>
    %c0_52 = arith.constant 0 : index
    %c0_53 = arith.constant 0 : index
    %c0_54 = arith.constant 0 : index
    %113 = vector.load %arg6[%c0_52, %c0_53, %c0_54] : memref<1x12x256xf32, #tpu.memory_space<vmem>>, vector<1x12x256xf32>
    %114 = vector.shape_cast %113 : vector<1x12x256xf32> to vector<12x256xf32>
    %115 = vector.shape_cast %112 : vector<12x256xf32> to vector<1x12x256xf32>
    tpu.vector_store %arg6[%c0_52, %c0_53, %c0_54], %115 {strides = array<i32>} : memref<1x12x256xf32, #tpu.memory_space<vmem>>, vector<1x12x256xf32>,
    return
  }
  func.func @transform_0(%arg0: i32, %arg1: i32) -> (i32, i32, i32) {
    %c0_i32 = arith.constant 0 : i32
    %c0_i32_0 = arith.constant 0 : i32
    return %arg0, %c0_i32, %arg1 : i32, i32, i32
  }
  func.func @transform_1(%arg0: i32, %arg1: i32) -> (i32, i32, i32, i32, i32) {
    %c0_i32 = arith.constant 0 : i32
    %c0_i32_0 = arith.constant 0 : i32
    %c0_i32_1 = arith.constant 0 : i32
    %c0_i32_2 = arith.constant 0 : i32
    return %arg0, %arg1, %c0_i32, %c0_i32_0, %c0_i32_1 : i32, i32, i32, i32, i32
  }
  func.func @transform_2(%arg0: i32, %arg1: i32) -> (i32, i32, i32) {
    %c0_i32 = arith.constant 0 : i32
    %c0_i32_0 = arith.constant 0 : i32
    %c0_i32_1 = arith.constant 0 : i32
    %c0_i32_2 = arith.constant 0 : i32
    return %c0_i32, %c0_i32_0, %c0_i32_1 : i32, i32, i32
  }
  func.func @transform_3(%arg0: i32, %arg1: i32) -> (i32, i32) {
    %c0_i32 = arith.constant 0 : i32
    %c0_i32_0 = arith.constant 0 : i32
    %c0_i32_1 = arith.constant 0 : i32
    return %c0_i32, %c0_i32_0 : i32, i32
  }
  func.func @transform_4(%arg0: i32, %arg1: i32) -> (i32, i32, i32) {
    %c0_i32 = arith.constant 0 : i32
    %c0_i32_0 = arith.constant 0 : i32
    return %arg0, %c0_i32, %arg1 : i32, i32, i32
  }
}

</mosaic_0001>

<bundles_post_ra>
// kernel: tpu_custom_call.1
= control target key start
LH: loop header
LB: loop body
LE: loop exit
PB: predicated region body
PF: predicated region fallthrough
CT: control target
= control target key end

     0   :  { %s1576_s15 = smov 0   ;;  %s1578_s16 = smov 0   ;;  %s1826_s0 = inlined_call_operand.vmem [shape: f32[2,4,256], index: 0, kind: input, shape index: {}]   ;;  %s1827_s1 = inlined_call_operand.vmem [shape: f32[2,1,2,4,16], index: 1, kind: input, shape index: {}]   ;;  %s1828_s2 = inlined_call_operand.vmem [shape: f32[9,12,4], index: 2, kind: input, shape index: {}]   ;;  %s1829_s3 = inlined_call_operand.vmem [shape: f32[12,1], index: 3, kind: input, shape index: {}]   ;;  %s1830_s4 = inlined_call_operand.vmem [shape: f32[2,12,256], index: 4, kind: output, shape index: {}]  }
   0x1   :  { %s1580_s17 = smov 0  }
   0x2 LB: > { %s26_s18 = sadd.s32 1, %s1539_s16  ;;  %p1389_p0 = scmp.ge.s32.totalorder %s1543_s17, 1  ;;  %s1543_s17 = sphi %s1580_s17, %s14_s17   ;;  %s1539_s16 = sphi %s1578_s16, %s1840_s16   ;;  %s1535_s15 = sphi %s1576_s15, %s1839_s15  }
   0x3   : > { %p28_p1 = scmp.ge.s32.totalorder %s26_s18, 2  ;;  %p199_p2 = scmp.lt.s32.totalorder %s1543_s17, 3 }
   0x5   : > { %s1842_s18 = smov (%p28_p1, %s26_s18), 0  ;;  %p200_p3 = pnand %p1389_p0, %p199_p2 }
   0x6   : > { %p243_p4 = scmp.lt.s32.totalorder (!%p200_p3), %s1535_s15, 1  ;;  %s1545_s23 = smov (!%p200_p3), 16   ;;  %vm373_vm0 = vcmask (!%p200_p3), 1043456   ;;  %v1548_v3 = vmov (!%p200_p3), 0.0   ;;  %vm366_vm1 = vcmask (!%p200_p3), 31744   ;;  %v1419_v4 = vld [vmem:[%s1828_s2 + $0x40] sm:$0xff] (!%p200_p3)  ;;  %v297_v5 = vlaneseq (!%p200_p3) }
   0x7   : > { %203 = sbr.rel (%p200_p3) target bundleno = 503 (0x1f7), region = 36  ;;  %s1546_s24 = smov (!%p200_p3), 112   ;;  %442 = vmatprep.mubr.f32.mxu1 (!%p200_p3), %v1548_v3  ;;  %835 = vmatprep.mubr.f32.mxu0 (!%p200_p3), %v1548_v3  ;;  %vm281_vm2 = vcmask (!%p200_p3), 130048   ;;  %vm289_vm3 = vcmask (!%p200_p3), 916480   ;;  %v1397_v15 = vld [vmem:[%s1828_s2 + $0x10] sm:$0xff] (!%p200_p3)  ;;  %vm349_vm4 = vcmask (!%p200_p3), 1039360  }
   0x8   : > { %s1547_s28 = smov (!%p200_p3), 127   ;;  %v298_v7 = vand.u32 (!%p200_p3), 127, %v297_v5  ;;  %s1549_s5 = smov (!%p200_p3), 1   ;;  %v1398_v21 = vld [vmem:[%s1828_s2 + $0x18] sm:$0xf] (!%p200_p3)  ;;  %v1425_v30 = vld [vmem:[%s1828_s2 + $0x50] sm:$0xff] (!%p200_p3) }
   0x9   : > { %v1426_v31 = vld [vmem:[%s1828_s2 + $0x58] sm:$0xf] (!%p200_p3)  ;;  %v1257_v32 = vld [vmem:[%s1829_s3] sm:$0xff] (!%p200_p3)  ;;  %v1258_v33 = vld [vmem:[%s1829_s3 + $0x8] sm:$0xf] (!%p200_p3)  ;;  %v1550_v34 = vmov (!%p200_p3), 0  }
   0xa   : > { %v299_v11 = vadd.s32 (!%p200_p3), 128, %v298_v7  ;;  %v304_v17 = vand.u32 (!%p200_p3), 15, %v298_v7  ;;  %1518 = vset.pattern.permute.xlu1 (!%p200_p3), %v1550_v34  ;;  %1519 = vset.pattern.permute.xlu0 (!%p200_p3), %v1550_v34  ;;  %vm334_vm7 = vcmask (!%p200_p3), 7168   ;;  %v361_v44 = vld [vmem:[%s1828_s2] sm:$0xff] (!%p200_p3)  ;;  %v362_v51 = vld [vmem:[%s1828_s2 + $0x8] sm:$0xf] (!%p200_p3) }
   0xb   : > { %v1407_v58 = vld [vmem:[%s1828_s2 + $0x20] sm:$0xff] (!%p200_p3) }
   0xc   : > { %v311_v18 = vand.u32 (!%p200_p3), 15, %v299_v11  ;;  %vm1649_vm5 = vcmp.ne.s32.totalorder (!%p200_p3), %v304_v17, 15  ;;  %vm1694_vm8 = vcmp.ne.s32.totalorder (!%p200_p3), %v304_v17, 0  ;;  %v1431_v59 = vld [vmem:[%s1828_s2 + $0x60] sm:$0xff] (!%p200_p3)  ;;  %v1413_v11 = vld [vmem:[%s1828_s2 + $0x30] sm:$0xff] (!%p200_p3) }
   0xe   : > { %s1844_s15 = smov (!%p243_p4, %s1535_s15), 1  ;;  %vm1653_vm6 = vcmp.ne.s32.totalorder %v311_v18, 15  ;;  %vm1698_vm9 = vcmp.ne.s32.totalorder %v311_v18, 0 }
   0xf   : > { %s1451_s19 = sshll.u32 %s1844_s15, 3  ;;  %s1453_s26 = sshll.u32 %s1844_s15, 5 }
  0x10   : > { %s250_s22 = scalar_lea.vmem %s1826_s0, %s1451_s19  ;;  %s260_s27 = scalar_lea.vmem %s1827_s1, %s1451_s19 }
  0x11   : > { %v1600_v0 = vld [vmem:[%s250_s22] sm:$0xff]  ;;  %s269_s29 = scalar_lea.vmem %s1830_s4, %s1453_s26 }
  0x12   : > { %277 = vrot.lane.b32.xlu0 %v1600_v0, %s1545_s23  ;;  %285 = vrot.lane.b32.xlu1 %v1600_v0, %s1546_s24  ;;  %v1606_v1 = vcombine.high %v1600_v0, %v1600_v0  ;;  %v1396_v2 = vld [vmem:[%s260_s27 + $0x4] sm:$0xf]  ;;  %v272_v6 = vld [vmem:[%s260_s27] sm:$0xf] }
  0x14   : > { %1421 = vmatprep.subr.msk.mxu0 %vm373_vm0, %v1606_v1 }
  0x15   : > { %1422 = vmatpush1.msk.msra.mxu0 %vm373_vm0, %v1600_v0 }
  0x16   : > { %279 = vrot.lane.b32.xlu0 %v1606_v1, %s1545_s23  ;;  %287 = vrot.lane.b32.xlu1 %v1606_v1, %s1546_s24 }
  0x17   : > { %1423 = vmatmul.mubr.msk.f32.vlgmr.msra.gmra.mrb[0].mxu0 %vm366_vm1, %v1419_v4  ;;  %v1432_v4 = vld [vmem:[%s1828_s2 + $0x68] sm:$0xf] }
  0x18   : > { %931 = vmatprep.mubr.f32.mxu0 %v1548_v3 }
  0x1a   : > { %293 = vrot.lane.b32.xlu0 %v1396_v2, %s1546_s24  ;;  %651 = vrot.lane.b32.xlu1 %v1600_v0, %s1547_s28  ;;  %v1408_v2 = vld [vmem:[%s1828_s2 + $0x28] sm:$0xf] }
  0x1e   : > { %653 = vrot.lane.b32.xlu0 %v1606_v1, %s1547_s28 }
  0x84   : > { %v278_v8 = vpop.permute.xlu0 %277  ;;  %v286_v9 = vpop.permute.xlu1 %285 }
  0x85   : > { %v284_v10 = vsel %vm281_vm2, %v272_v6, %v278_v8 }
  0x86   : > { %332 = vrot.lane.b32.xlu0 %v284_v10, %s1549_s5 }
  0x88   : > { %v280_v12 = vpop.permute.xlu0 %279  ;;  %v288_v13 = vpop.permute.xlu1 %287 }
  0x89   : > { %v282_v14 = vsel %vm281_vm2, %v278_v8, %v280_v12  ;;  %v1636_v16 = vsel %vm289_vm3, %v286_v9, %v288_v13  ;;  %v1437_v12 = vld [vmem:[%s1828_s2 + $0x70] sm:$0xff] }
  0x8a   : > { %347 = vrot.lane.b32.xlu0 %v282_v14, %s1547_s28  ;;  %328 = vrot.lane.b32.xlu1 %v282_v14, %s1549_s5 }
  0x8b   : > { %1399 = vmatprep.subr.msk.mxu1 %vm373_vm0, %v282_v14  ;;  %v1414_v14 = vld [vmem:[%s1828_s2 + $0x38] sm:$0xf] }
  0x8c   : > { %1400 = vmatpush1.msk.msra.mxu1 %vm373_vm0, %v284_v10  ;;  %v294_v19 = vpop.permute.xlu0 %293  ;;  %v652_v20 = vpop.permute.xlu1 %651 }
  0x8d   : > { %1401 = vmatmul.mubr.msk.f32.vlgmr.msra.gmra.mrb[0].mxu1 %vm366_vm1, %v1397_v15  ;;  %v1647_v22 = vsel %vm289_vm3, %v288_v13, %v294_v19  ;;  %v1438_v15 = vld [vmem:[%s1828_s2 + $0x78] sm:$0xf] }
  0x8e   : > { %952 = vrot.lane.b32.xlu0 %v1636_v16, %s1549_s5  ;;  %345 = vrot.lane.b32.xlu1 %v284_v10, %s1547_s28 }
  0x8f   : > { %448 = vmatprep.mubr.f32.mxu1 %v1548_v3 }
  0x90   : > { %v654_v25 = vpop.permute.xlu0 %653 }
  0x91   : > { %v655_v26 = vsel %vm349_vm4, %v652_v20, %v654_v25  ;;  %v659_v27 = vsel %vm349_vm4, %v654_v25, %v652_v20  ;;  %1402 = vmatmul.mubr.msk.f32.gmra.mrb[2].mxu1 %vm366_vm1, %v1398_v21 }
  0x92   : > { %643 = vrot.lane.b32.xlu0 %v1600_v0, %s1549_s5  ;;  %949 = vrot.lane.b32.xlu1 %v1647_v22, %s1549_s5  ;;  %v660_v28 = vsel %vm1649_vm5, %v655_v26, 0.0  ;;  %v661_v29 = vsel %vm1653_vm6, %v659_v27, 0.0 }
  0x93   : > { %1427 = vmatprep.subr.msk.mxu0 %vm373_vm0, %v661_v29  ;;  %531 = vmatprep.mubr.f32.mxu1 %v1548_v3 }
  0x94   : > { %1428 = vmatpush1.msk.msra.mxu0 %vm373_vm0, %v660_v28 }
  0x95   : > { %1429 = vmatmul.mubr.msk.f32.vlgmr.msra.gmra.mrb[0].mxu0 %vm366_vm1, %v1425_v30 }
  0x96   : > { %962 = vrot.lane.b32.xlu0 %v1647_v22, %s1547_s28  ;;  %640 = vrot.lane.b32.xlu1 %v1606_v1, %s1549_s5 }
  0x97   : > { %937 = vmatprep.mubr.f32.mxu0 %v1548_v3 }
  0x99   : > { %1430 = vmatmul.mubr.msk.f32.gmra.mrb[2].mxu0 %vm366_vm1, %v1426_v31 }
  0x9a   : > { %960 = vrot.lane.b32.xlu1 %v1636_v16, %s1547_s28  ;;  %1050 = vmatprep.mubr.f32.mxu0 %v1548_v3 }
  0x9b   : > { %1266 = vperm.xlu0 %1519, %v1258_v33  }
  0x9e   : > { %1261 = vperm.xlu1 %1518, %v1257_v32  }
  0xf8   : > { %v333_v35 = vpop.permute.xlu0 %332 }
  0xfc   : > { %v329_v38 = vpop.permute.xlu1 %328  ;;  %v348_v39 = vpop.permute.xlu0 %347 }
  0xfd   : > { %v335_v40 = vsel %vm334_vm7, %v333_v35, %v329_v38  ;;  %v338_v41 = vsel %vm334_vm7, %v329_v38, %v333_v35 }
  0xfe   : > { %v343_v42 = vsel %vm1694_vm8, %v338_v41, 0.0  ;;  %v344_v43 = vsel %vm1698_vm9, %v335_v40, 0.0 }
  0xff   : > { %1403 = vmatprep.subr.msk.mxu1 %vm373_vm0, %v344_v43 }
 0x100   : > { %v346_v45 = vpop.permute.xlu1 %345  ;;  %1404 = vmatpush1.msk.msra.mxu1 %vm373_vm0, %v343_v42  ;;  %v953_v46 = vpop.permute.xlu0 %952 }
 0x101   : > { %v350_v47 = vsel %vm349_vm4, %v346_v45, %v348_v39  ;;  %v354_v48 = vsel %vm349_vm4, %v348_v39, %v346_v45  ;;  %1405 = vmatmul.mubr.msk.f32.vlgmr.msra.gmra.mrb[0].mxu1 %vm366_vm1, %v361_v44 }
 0x102   : > { %v359_v49 = vsel %vm1649_vm5, %v350_v47, 0.0  ;;  %v360_v50 = vsel %vm1653_vm6, %v354_v48, 0.0  ;;  %537 = vmatprep.mubr.f32.mxu1 %v1548_v3 }
 0x103   : > { %1409 = vmatprep.subr.msk.mxu1 %vm373_vm0, %v360_v50 }
 0x104   : > { %v950_v52 = vpop.permute.xlu1 %949  ;;  %1410 = vmatpush1.msk.msra.mxu1 %vm373_vm0, %v359_v49  ;;  %v644_v57 = vpop.permute.xlu0 %643 }
 0x105   : > { %v954_v53 = vsel %vm334_vm7, %v953_v46, %v950_v52  ;;  %v957_v54 = vsel %vm334_vm7, %v950_v52, %v953_v46  ;;  %1406 = vmatmul.mubr.msk.f32.gmra.mrb[2].mxu1 %vm366_vm1, %v362_v51 }
 0x106   : > { %v958_v55 = vsel %vm1694_vm8, %v957_v54, 0.0  ;;  %v959_v56 = vsel %vm1698_vm9, %v954_v53, 0.0  ;;  %623 = vmatprep.mubr.f32.mxu1 %v1548_v3 }
 0x107   : > { %1433 = vmatprep.subr.msk.mxu0 %vm373_vm0, %v959_v56 }
 0x108   : > { %v641_v60 = vpop.permute.xlu1 %640  ;;  %1434 = vmatpush1.msk.msra.mxu0 %vm373_vm0, %v958_v55  ;;  %v963_v6 = vpop.permute.xlu0 %962 }
 0x109   : > { %v645_v61 = vsel %vm334_vm7, %v644_v57, %v641_v60  ;;  %v648_v62 = vsel %vm334_vm7, %v641_v60, %v644_v57  ;;  %1411 = vmatmul.mubr.msk.f32.vlgmr.msra.gmra.mrb[0].mxu1 %vm366_vm1, %v1407_v58  ;;  %1435 = vmatmul.mubr.msk.f32.vlgmr.msra.gmra.mrb[0].mxu0 %vm366_vm1, %v1431_v59 }
 0x10a   : > { %v650_v63 = vsel %vm1698_vm9, %v645_v61, 0.0  ;;  %1439 = vmatprep.subr.msk.mxu0 %vm373_vm0, %v1647_v22  ;;  %629 = vmatprep.mubr.f32.mxu1 %v1548_v3  ;;  %v649_v5 = vsel %vm1694_vm8, %v648_v62, 0.0 }
 0x10b   : > { %1440 = vmatpush1.msk.msra.mxu0 %vm373_vm0, %v1636_v16  ;;  %1056 = vmatprep.mubr.f32.mxu0 %v1548_v3  ;;  %v1444_v16 = vld [vmem:[%s1828_s2 + $0x88] sm:$0xf] }
 0x10c   : > { %v961_v7 = vpop.permute.xlu1 %960  ;;  %1415 = vmatprep.subr.msk.mxu1 %vm373_vm0, %v650_v63 }
 0x10d   : > { %v968_v8 = vsel %vm349_vm4, %v963_v6, %v961_v7  ;;  %1412 = vmatmul.mubr.msk.f32.gmra.mrb[2].mxu1 %vm366_vm1, %v1408_v2  ;;  %1436 = vmatmul.mubr.msk.f32.gmra.mrb[2].mxu0 %vm366_vm1, %v1432_v4  ;;  %v964_v9 = vsel %vm349_vm4, %v961_v7, %v963_v6 }
 0x10e   : > { %v970_v10 = vsel %vm1653_vm6, %v968_v8, 0.0  ;;  %1416 = vmatpush1.msk.msra.mxu1 %vm373_vm0, %v649_v5  ;;  %741 = vmatprep.mubr.f32.mxu1 %v1548_v3  ;;  %v969_v13 = vsel %vm1649_vm5, %v964_v9, 0.0 }
 0x10f   : > { %1445 = vmatprep.subr.msk.mxu0 %vm373_vm0, %v970_v10  ;;  %1144 = vmatprep.mubr.f32.mxu0 %v1548_v3 }
 0x110   : > { %1454 = vmatprep.subr.msk.mxu1 %vm373_vm0, %v1606_v1  ;;  %v1443_v1 = vld [vmem:[%s1828_s2 + $0x80] sm:$0xff] }
 0x111   : > { %1417 = vmatmul.mubr.msk.f32.vlgmr.msra.gmra.mrb[0].mxu1 %vm366_vm1, %v1413_v11  ;;  %1441 = vmatmul.mubr.msk.f32.vlgmr.msra.gmra.mrb[0].mxu0 %vm366_vm1, %v1437_v12 }
 0x112   : > { %1446 = vmatpush1.msk.msra.mxu0 %vm373_vm0, %v969_v13  ;;  %747 = vmatprep.mubr.f32.mxu1 %v1548_v3 }
 0x113   : > { %1150 = vmatprep.mubr.f32.mxu0 %v1548_v3  ;;  %1455 = vmatpush1.msk.msra.mxu1 %vm373_vm0, %v1600_v0  ;;  %v1420_v0 = vld [vmem:[%s1828_s2 + $0x48] sm:$0xf] }
 0x115   : > { %1418 = vmatmul.mubr.msk.f32.gmra.mrb[2].mxu1 %vm366_vm1, %v1414_v14  ;;  %1442 = vmatmul.mubr.msk.f32.gmra.mrb[2].mxu0 %vm366_vm1, %v1438_v15 }
 0x116   : > { %1240 = vmatprep.mubr.f32.mxu0 %v1548_v3  ;;  %841 = vmatprep.mubr.f32.mxu1 %v1548_v3 }
 0x119   : > { %1447 = vmatmul.mubr.msk.f32.vlgmr.msra.gmra.mrb[0].mxu0 %vm366_vm1, %v1443_v1 }
 0x11a   : > { %1246 = vmatprep.mubr.f32.mxu0 %v1548_v3  ;;  %v1267_v24 = vpop.permute.xlu0 %1266 }
 0x11d   : > { %1424 = vmatmul.mubr.msk.f32.vlgmr.msra.gmra.mrb[2].mxu1 %vm366_vm1, %v1420_v0  ;;  %1448 = vmatmul.mubr.msk.f32.gmra.mrb[2].mxu0 %vm366_vm1, %v1444_v16  ;;  %v1262_v20 = vpop.permute.xlu1 %1261 }
 0x1e4   : > { %v743_v17 = vpop.f32.mrb[0].mxu1 }
 0x1e5   : > { %v745_v18 = vpop.f32.mrb[1].mxu1 }
 0x1ec   : > { %v1242_v19 = vpop.f32.mrb[0].mxu0 }
 0x1ed   : > { %v1456_v21 = vadd.f32 %v1242_v19, %v743_v17  ;;  %v1244_v22 = vpop.f32.mrb[1].mxu0 }
 0x1ee   : > { %v1457_v3 = vadd.f32 %v1244_v22, %v745_v18 }
 0x1ef   : > { %v1269_v23 = vadd.f32 %v1456_v21, %v1262_v20 }
 0x1f0   : > { %v1270_v25 = vadd.f32 %v1457_v3, %v1262_v20  ;;  %v843_v26 = vpop.f32.mrb[2].mxu1  ;;  %v1248_v27 = vpop.f32.mrb[2].mxu0 }
 0x1f1   : > { %1273 = vst [vmem:[%s269_s29] sm:$0xff] %v1269_v23  ;;  %v1458_v28 = vadd.f32 %v1248_v27, %v843_v26  ;;  %v845_v29 = vpop.f32.mrb[3].mxu1  ;;  %v1250_v30 = vpop.f32.mrb[3].mxu0 }
 0x1f2   : > { %1274 = vst [vmem:[%s269_s29 + $0x8] sm:$0xff] %v1270_v25  ;;  %v1459_v31 = vadd.f32 %v1250_v30, %v845_v29 }
 0x1f3   : > { %v1271_v32 = vadd.f32 %v1458_v28, %v1267_v24 }
 0x1f4   : > { %v1272_v33 = vadd.f32 %v1459_v31, %v1267_v24 }
 0x1f5   : > { %1275 = vst [vmem:[%s269_s29 + $0x10] sm:$0xf] %v1271_v32 }
 0x1f6   : > { %1276 = vst [vmem:[%s269_s29 + $0x18] sm:$0xf] %v1272_v33 }
 0x1f7 PF: > { %s14_s17 = sadd.s32 1, %s1543_s17   ;;  %s1839_s15 = smov %s1539_s16 }
 0x1f8   : > { %p11_p5 = scmp.ge.s32.totalorder %s14_s17, 4   ;;  %s1840_s16 = smov %s1842_s18 }
 0x1fa   :  { %13 = sbr.rel (!%p11_p5) target bundleno = 2 (0x2), region = 78 }

</bundles_post_ra>
